<compile_context>
chip_gen: v7x
topology: tpu7x:2x2x1
jax: 0.10.0
libtpu: 0.0.40
codegen_flags: <defaults>
</compile_context>

<pallas_src>
import functools

import jax
import jax.numpy as jnp
from jax import lax
from jax.experimental import pallas as pl
from jax.experimental.pallas import tpu as pltpu

LN_EPS = 1e-5  # torch.nn.LayerNorm default


# ---------------------------------------------------------------------------
# Hardware / tiling helpers
# ---------------------------------------------------------------------------
def _round_up(v, m):
    return ((v + m - 1) // m) * m


def _sublane_multiple(dtype):
    # 8 rows for 32-bit, 16 for bf16, 32 for int8 (sublane packing minimum).
    return max(8, 32 // jnp.dtype(dtype).itemsize)


@functools.lru_cache(maxsize=None)
def _vmem_limit_bytes():
    """Generation-aware scoped-VMEM limit.

    ~96 MiB on 128-MiB parts (v5e/v6e), ~48 MiB on v7x (64 MiB per core).
    """
    cap = None
    try:
        info = pltpu.get_tpu_info()
        cap = int(getattr(info, "vmem_capacity_bytes", 0)) or None
    except Exception:
        cap = None
    if cap is None:
        cap = 64 * 1024 * 1024  # conservative (v7x-sized) fallback
    return min((cap * 3) // 4, 112 * 1024 * 1024)


def _ln_row_tile(n_rows, d, dtype, budget_bytes):
    """Row tile for the HBM-bound LayerNorm kernel (~4-8 MiB per block)."""
    dtype = jnp.dtype(dtype)
    sub = _sublane_multiple(dtype)
    row_bytes = d * dtype.itemsize
    # One streamed input + one output, each double-buffered -> 4*row_bytes/row.
    target = min(8 * 1024 * 1024, budget_bytes // 2)
    tm = max(sub, target // max(4 * row_bytes, 1))
    tm = min(tm, 1024)
    tm = (tm // 128) * 128 if tm >= 128 else (tm // sub) * sub
    tm = max(tm, sub)
    if n_rows > sub:
        # Keep >= 2 row-grid steps so the "parallel" axis spans both v7x cores.
        tm = min(tm, _round_up((n_rows + 1) // 2, sub))
    if tm >= n_rows:
        tm = n_rows
    return tm


def _fused_tiles(n_rows, d, e, x_dtype, w_dtype, budget_bytes):
    """(tm, tn, mm_dtype) for the fused LayerNorm + Linear kernel."""
    x_dtype, w_dtype = jnp.dtype(x_dtype), jnp.dtype(w_dtype)
    # MXU-native operands: keep bf16 end-to-end when both x and W are bf16;
    # accumulation is always f32 via preferred_element_type.
    mm_dtype = (jnp.bfloat16
                if x_dtype == jnp.bfloat16 and w_dtype == jnp.bfloat16
                else jnp.float32)
    xb, wb = x_dtype.itemsize, w_dtype.itemsize
    mmb = jnp.dtype(mm_dtype).itemsize
    ob = xb
    sub = _sublane_multiple(x_dtype)

    # Column tile: prefer full-E residency (constant block index -> W is
    # DMA'd from HBM exactly once instead of once per row tile).
    w_budget = budget_bytes // 2
    if e <= 128 or 2 * d * e * wb <= w_budget:
        tn = e
    else:
        tn = max(128, ((w_budget // (2 * d * wb)) // 128) * 128)
        tn = min(tn, e)
        # TODO(synk): for very large D on v7x (64 MiB VMEM) add a K(=D) grid
        # axis with an f32 accumulator scratch instead of only shrinking tn.

    # Row tile from the remaining budget: x tile (x2 bufs) + LN scratch +
    # output tile (x2 bufs). W tile (x2), bias, gamma/beta are "fixed".
    per_row = 2 * d * xb + d * mmb + 2 * tn * ob
    fixed = 2 * d * tn * wb + 2 * tn * 4 + 4 * d * 4
    avail = max(budget_bytes - fixed, per_row * sub)
    tm = max(sub, avail // per_row)
    tm = min(tm, 1024)
    tm = (tm // 128) * 128 if tm >= 128 else (tm // sub) * sub
    tm = max(tm, sub)
    if n_rows > sub:
        # >= 2 row-grid steps for v7x's two TensorCores.
        tm = min(tm, _round_up((n_rows + 1) // 2, sub))
    if tm >= n_rows:
        tm = n_rows
    return tm, tn, mm_dtype


def _layernorm_f32(x, gamma, beta):
    mean = jnp.mean(x, axis=-1, keepdims=True)
    centered = x - mean
    var = jnp.mean(centered * centered, axis=-1, keepdims=True)  # biased (torch)
    inv = lax.rsqrt(var + LN_EPS)
    return centered * inv * gamma + beta


# ---------------------------------------------------------------------------
# Kernel 1: standalone LayerNorm (+ optional fused elementwise activation)
# ---------------------------------------------------------------------------
def _make_ln_kernel(act_fn):
    def kernel(x_ref, gamma_ref, beta_ref, o_ref):
        x = x_ref[...].astype(jnp.float32)
        g = gamma_ref[...].astype(jnp.float32)
        b = beta_ref[...].astype(jnp.float32)
        y = _layernorm_f32(x, g, b)
        if act_fn is not None:
            y = act_fn(y)  # elementwise -> VPU/EUP, free under the DMA
        o_ref[...] = y.astype(o_ref.dtype)
    return kernel


def layernorm_pallas(x, gamma, beta, activation=None):
    """LayerNorm over the last axis (torch semantics), optional fused act."""
    orig_shape = x.shape
    D = orig_shape[-1]
    x2 = x.reshape(-1, D)  # free (contiguous) reshape
    R = x2.shape[0]

    vmem_limit = _vmem_limit_bytes()
    tm = _ln_row_tile(R, D, x2.dtype, int(vmem_limit * 0.8))

    out = pl.pallas_call(
        _make_ln_kernel(activation),
        out_shape=jax.ShapeDtypeStruct((R, D), x.dtype),
        grid_spec=pltpu.PrefetchScalarGridSpec(
            num_scalar_prefetch=0,
            grid=(pl.cdiv(R, tm),),
            in_specs=[
                pl.BlockSpec((tm, D), lambda i: (i, 0)),
                pl.BlockSpec((1, D), lambda i: (0, 0)),
                pl.BlockSpec((1, D), lambda i: (0, 0)),
            ],
            out_specs=pl.BlockSpec((tm, D), lambda i: (i, 0)),
        ),
        compiler_params=pltpu.CompilerParams(
            dimension_semantics=("parallel",),
            vmem_limit_bytes=vmem_limit,
        ),
    )(x2, gamma.reshape(1, D), beta.reshape(1, D))
    return out.reshape(orig_shape)


# ---------------------------------------------------------------------------
# Kernel 2: fused LayerNorm + Linear (the common PreNorm(dim, Linear) case)
# ---------------------------------------------------------------------------
def _prenorm_linear_kernel(x_ref, gamma_ref, beta_ref, w_ref, b_ref,
                           o_ref, y_ref):
    # grid = (row_tiles, col_tiles); the column axis is innermost
    # ("arbitrary"), so the normalized row tile held in the VMEM scratch is
    # reused across all output-column tiles of the same row tile.
    @pl.when(pl.program_id(1) == 0)
    def _():
        x = x_ref[...].astype(jnp.float32)
        g = gamma_ref[...].astype(jnp.float32)
        b = beta_ref[...].astype(jnp.float32)
        # Scratch keeps the matmul dtype (bf16 when x/W are bf16) so the MXU
        # runs on native operands; accumulation stays f32.
        y_ref[...] = _layernorm_f32(x, g, b).astype(y_ref.dtype)

    acc = jnp.dot(y_ref[...], w_ref[...], preferred_element_type=jnp.float32)
    o_ref[...] = (acc + b_ref[...].astype(jnp.float32)).astype(o_ref.dtype)


def prenorm_linear_pallas(x, gamma, beta, weight, bias):
    """Fused:  LayerNorm(x) @ weight + bias   (weight: (D, E), bias: (E,))."""
    orig_shape = x.shape
    D = orig_shape[-1]
    E = weight.shape[1]
    x2 = x.reshape(-1, D)
    R = x2.shape[0]

    vmem_limit = _vmem_limit_bytes()
    tm, tn, mm_dtype = _fused_tiles(R, D, E, x2.dtype, weight.dtype,
                                    int(vmem_limit * 0.8))

    out = pl.pallas_call(
        _prenorm_linear_kernel,
        out_shape=jax.ShapeDtypeStruct((R, E), x.dtype),
        grid_spec=pltpu.PrefetchScalarGridSpec(
            num_scalar_prefetch=0,
            grid=(pl.cdiv(R, tm), pl.cdiv(E, tn)),
            in_specs=[
                pl.BlockSpec((tm, D), lambda i, j: (i, 0)),   # x row tile
                pl.BlockSpec((1, D), lambda i, j: (0, 0)),    # gamma
                pl.BlockSpec((1, D), lambda i, j: (0, 0)),    # beta
                pl.BlockSpec((D, tn), lambda i, j: (0, j)),   # W (resident if tn==E)
                pl.BlockSpec((1, tn), lambda i, j: (0, j)),   # bias
            ],
            out_specs=pl.BlockSpec((tm, tn), lambda i, j: (i, j)),
            scratch_shapes=[pltpu.VMEM((tm, D), mm_dtype)],   # LN row tile
        ),
        compiler_params=pltpu.CompilerParams(
            dimension_semantics=("parallel", "arbitrary"),
            vmem_limit_bytes=vmem_limit,
        ),
    )(x2, gamma.reshape(1, D), beta.reshape(1, D), weight, bias.reshape(1, E))
    return out.reshape(orig_shape[:-1] + (E,))


# ---------------------------------------------------------------------------
# Module wrappers
# ---------------------------------------------------------------------------
class Linear:
    """Deterministic JAX Linear(in -> out); recognized for kernel fusion."""

    def __init__(self, weight, bias):
        self.weight = weight  # (in_dim, out_dim)
        self.bias = bias      # (out_dim,)

    def __call__(self, x):
        return jnp.einsum("...d,de->...e", x, self.weight) + self.bias


# Elementwise fns that get fused into the LayerNorm kernel body.
_FUSIBLE_ELEMENTWISE = (jax.nn.gelu, jax.nn.relu, jax.nn.silu,
                        jax.nn.sigmoid, jnp.tanh)


class PreNormPallas:
    """JAX equivalent of PreNorm(dim, fn): y = fn(LayerNorm(x), **kwargs)."""

    def __init__(self, dim, fn):
        self.dim = dim
        self.fn = fn
        # nn.LayerNorm defaults: weight = ones, bias = zeros.
        self.gamma = jnp.ones((dim,), jnp.float32)
        self.beta = jnp.zeros((dim,), jnp.float32)

    def __call__(self, x, **kwargs):
        if isinstance(self.fn, Linear) and not kwargs:
            # Fused path: LN + matmul in one kernel, weight kept VMEM-resident
            # when it fits, MXU fed native-dtype operands.
            return prenorm_linear_pallas(
                x, self.gamma, self.beta, self.fn.weight, self.fn.bias)
        if not kwargs and any(self.fn is f for f in _FUSIBLE_ELEMENTWISE):
            # Fused elementwise path: activation applied inside the LN kernel,
            # no extra HBM round trip of the LN output.
            return layernorm_pallas(x, self.gamma, self.beta,
                                    activation=self.fn)
        # Generic path: LN kernel, then arbitrary fn in plain JAX.
        y = layernorm_pallas(x, self.gamma, self.beta)
        return self.fn(y, **kwargs)


# ---------------------------------------------------------------------------
if __name__ == "__main__":
    key = jax.random.PRNGKey(0)
    B, S, D = 2, 8, 32  # batch, seq, hidden

    kx, kw, kb = jax.random.split(key, 3)
    x = jax.random.normal(kx, (B, S, D), dtype=jnp.float32)
    W = jax.random.normal(kw, (D, D), dtype=jnp.float32) * 0.02
    b = jax.random.normal(kb, (D,), dtype=jnp.float32) * 0.02

    def ref_layernorm(v):
        mean = jnp.mean(v, axis=-1, keepdims=True)
        var = jnp.mean((v - mean) ** 2, axis=-1, keepdims=True)
        return (v - mean) / jnp.sqrt(var + LN_EPS)

    # (1) Fused path (f32): fn is a Linear -> single fused LN + matmul kernel.
    module = PreNormPallas(D, Linear(W, b))
    out = jax.block_until_ready(module(x))
    ref = jnp.einsum("bsd,de->bse", ref_layernorm(x), W) + b
    assert out.shape == (B, S, D)
    assert jnp.max(jnp.abs(out - ref)) < 1e-4

    # (2) Fused path with bf16 operands (exercises the MXU-native path).
    x16 = x.astype(jnp.bfloat16)
    W16 = W.astype(jnp.bfloat16)
    b16 = b.astype(jnp.bfloat16)
    module_bf16 = PreNormPallas(D, Linear(W16, b16))
    out16 = jax.block_until_ready(module_bf16(x16))
    ref16 = (jnp.einsum("bsd,de->bse",
                        ref_layernorm(x16.astype(jnp.float32)),
                        W16.astype(jnp.float32))
             + b16.astype(jnp.float32))
    assert out16.shape == (B, S, D)
    assert jnp.max(jnp.abs(out16.astype(jnp.float32) - ref16)) < 2e-2

    # (3) Generic path, fusible elementwise fn -> GELU fused into LN kernel.
    module2 = PreNormPallas(D, jax.nn.gelu)
    out2 = jax.block_until_ready(module2(x))
    ref2 = jax.nn.gelu(ref_layernorm(x))
    assert out2.shape == (B, S, D)
    assert jnp.max(jnp.abs(out2 - ref2)) < 1e-4

    # (4) Generic path, arbitrary fn -> LN kernel, then fn in plain JAX.
    module3 = PreNormPallas(D, lambda v: v * 2.0 + 1.0)
    out3 = jax.block_until_ready(module3(x))
    ref3 = ref_layernorm(x) * 2.0 + 1.0
    assert out3.shape == (B, S, D)
    assert jnp.max(jnp.abs(out3 - ref3)) < 1e-4

    print("KERNEL_OK")
</pallas_src>

<mosaic_0001>
module attributes {stable_mosaic.version = 11 : i64} {
  func.func @_prenorm_linear_kernel(%arg0: i32, %arg1: i32, %arg2: memref<8x32xf32, #tpu.memory_space<vmem>>, %arg3: memref<1x32xf32, #tpu.memory_space<vmem>>, %arg4: memref<1x32xf32, #tpu.memory_space<vmem>>, %arg5: memref<32x32xf32, #tpu.memory_space<vmem>>, %arg6: memref<1x32xf32, #tpu.memory_space<vmem>>, %arg7: memref<8x32xf32, #tpu.memory_space<vmem>>, %arg8: memref<8x32xf32, #tpu.memory_space<vmem>>) attributes {dimension_semantics = [#tpu.dimension_semantics<parallel>, #tpu.dimension_semantics<arbitrary>], iteration_bounds = array<i64: 2, 1>, scalar_prefetch = 0 : i64, scratch_operands = 1 : i64, tpu.core_type = #tpu.core_type<tc>, window_params = [{transform_indices = @transform_0, window_bounds = array<i64: 8, 32>}, {pipeline_mode = #tpu.pipeline_mode<synchronous>, transform_indices = @transform_1, window_bounds = array<i64: 1, 32>}, {pipeline_mode = #tpu.pipeline_mode<synchronous>, transform_indices = @transform_2, window_bounds = array<i64: 1, 32>}, {transform_indices = @transform_3, window_bounds = array<i64: 32, 32>}, {transform_indices = @transform_4, window_bounds = array<i64: 1, 32>}, {transform_indices = @transform_5, window_bounds = array<i64: 8, 32>}]} {
    %c0_i32 = arith.constant 0 : i32
    %0 = arith.cmpi eq, %arg1, %c0_i32 : i32
    %1 = arith.extui %0 : i1 to i32
    %c0_i32_0 = arith.constant 0 : i32
    %2 = arith.cmpi ne, %1, %c0_i32_0 : i32
    scf.if %2 {
      %c0_8 = arith.constant 0 : index
      %c0_9 = arith.constant 0 : index
      %10 = vector.load %arg2[%c0_8, %c0_9] : memref<8x32xf32, #tpu.memory_space<vmem>>, vector<8x32xf32>
      %c0_10 = arith.constant 0 : index
      %c0_11 = arith.constant 0 : index
      %11 = vector.load %arg3[%c0_10, %c0_11] : memref<1x32xf32, #tpu.memory_space<vmem>>, vector<1x32xf32>
      %c0_12 = arith.constant 0 : index
      %c0_13 = arith.constant 0 : index
      %12 = vector.load %arg4[%c0_12, %c0_13] : memref<1x32xf32, #tpu.memory_space<vmem>>, vector<1x32xf32>
      %cst_14 = arith.constant dense<0.000000e+00> : vector<8xf32>
      %13 = vector.multi_reduction <add>, %10, %cst_14 [1] : vector<8x32xf32> to vector<8xf32>
      %14 = vector.shape_cast %13 : vector<8xf32> to vector<8x1xf32>
      %cst_15 = arith.constant 3.200000e+01 : f32
      %15 = vector.broadcast %cst_15 : f32 to vector<8x1xf32>
      %16 = arith.divf %14, %15 : vector<8x1xf32>
      %17 = vector.broadcast %16 : vector<8x1xf32> to vector<8x32xf32>
      %18 = arith.subf %10, %17 : vector<8x32xf32>
      %19 = arith.mulf %18, %18 : vector<8x32xf32>
      %cst_16 = arith.constant dense<0.000000e+00> : vector<8xf32>
      %20 = vector.multi_reduction <add>, %19, %cst_16 [1] : vector<8x32xf32> to vector<8xf32>
      %21 = vector.shape_cast %20 : vector<8xf32> to vector<8x1xf32>
      %cst_17 = arith.constant 3.200000e+01 : f32
      %22 = vector.broadcast %cst_17 : f32 to vector<8x1xf32>
      %23 = arith.divf %21, %22 : vector<8x1xf32>
      %cst_18 = arith.constant 9.99999974E-6 : f32
      %24 = vector.broadcast %cst_18 : f32 to vector<8x1xf32>
      %25 = arith.addf %23, %24 : vector<8x1xf32>
      %26 = math.rsqrt %25 : vector<8x1xf32>
      %27 = vector.broadcast %26 : vector<8x1xf32> to vector<8x32xf32>
      %28 = arith.mulf %18, %27 : vector<8x32xf32>
      %29 = vector.broadcast %11 : vector<1x32xf32> to vector<8x32xf32>
      %30 = arith.mulf %28, %29 : vector<8x32xf32>
      %31 = vector.broadcast %12 : vector<1x32xf32> to vector<8x32xf32>
      %32 = arith.addf %30, %31 : vector<8x32xf32>
      %c0_19 = arith.constant 0 : index
      %c0_20 = arith.constant 0 : index
      %33 = vector.load %arg8[%c0_19, %c0_20] : memref<8x32xf32, #tpu.memory_space<vmem>>, vector<8x32xf32>
      tpu.vector_store %arg8[%c0_19, %c0_20], %32 {strides = array<i32>} : memref<8x32xf32, #tpu.memory_space<vmem>>, vector<8x32xf32>,
    } else {
    }
    %c0 = arith.constant 0 : index
    %c0_1 = arith.constant 0 : index
    %3 = vector.load %arg8[%c0, %c0_1] : memref<8x32xf32, #tpu.memory_space<vmem>>, vector<8x32xf32>
    %c0_2 = arith.constant 0 : index
    %c0_3 = arith.constant 0 : index
    %4 = vector.load %arg5[%c0_2, %c0_3] : memref<32x32xf32, #tpu.memory_space<vmem>>, vector<32x32xf32>
    %cst = arith.constant dense<0.000000e+00> : vector<8x32xf32>
    %5 = tpu.matmul %3, %4, %cst {dimension_numbers = #tpu.dot_dimension_numbers<[1], [0], [0], [1], [0, 0, 1, 1], [], []>} : vector<8x32xf32>, vector<32x32xf32>, vector<8x32xf32> -> vector<8x32xf32>
    %c0_4 = arith.constant 0 : index
    %c0_5 = arith.constant 0 : index
    %6 = vector.load %arg6[%c0_4, %c0_5] : memref<1x32xf32, #tpu.memory_space<vmem>>, vector<1x32xf32>
    %7 = vector.broadcast %6 : vector<1x32xf32> to vector<8x32xf32>
    %8 = arith.addf %5, %7 : vector<8x32xf32>
    %c0_6 = arith.constant 0 : index
    %c0_7 = arith.constant 0 : index
    %9 = vector.load %arg7[%c0_6, %c0_7] : memref<8x32xf32, #tpu.memory_space<vmem>>, vector<8x32xf32>
    tpu.vector_store %arg7[%c0_6, %c0_7], %8 {strides = array<i32>} : memref<8x32xf32, #tpu.memory_space<vmem>>, vector<8x32xf32>,
    return
  }
  func.func @transform_0(%arg0: i32, %arg1: i32) -> (i32, i32) {
    %c0_i32 = arith.constant 0 : i32
    %c0_i32_0 = arith.constant 0 : i32
    return %arg0, %c0_i32 : i32, i32
  }
  func.func @transform_1(%arg0: i32, %arg1: i32) -> (i32, i32) {
    %c0_i32 = arith.constant 0 : i32
    %c0_i32_0 = arith.constant 0 : i32
    %c0_i32_1 = arith.constant 0 : i32
    return %c0_i32, %c0_i32_0 : i32, i32
  }
  func.func @transform_2(%arg0: i32, %arg1: i32) -> (i32, i32) {
    %c0_i32 = arith.constant 0 : i32
    %c0_i32_0 = arith.constant 0 : i32
    %c0_i32_1 = arith.constant 0 : i32
    return %c0_i32, %c0_i32_0 : i32, i32
  }
  func.func @transform_3(%arg0: i32, %arg1: i32) -> (i32, i32) {
    %c0_i32 = arith.constant 0 : i32
    %c0_i32_0 = arith.constant 0 : i32
    return %c0_i32, %arg1 : i32, i32
  }
  func.func @transform_4(%arg0: i32, %arg1: i32) -> (i32, i32) {
    %c0_i32 = arith.constant 0 : i32
    %c0_i32_0 = arith.constant 0 : i32
    return %c0_i32, %arg1 : i32, i32
  }
  func.func @transform_5(%arg0: i32, %arg1: i32) -> (i32, i32) {
    %c0_i32 = arith.constant 0 : i32
    return %arg0, %arg1 : i32, i32
  }
}

</mosaic_0001>

<bundles_post_ra>
// kernel: tpu_custom_call.1
= control target key start
LH: loop header
LB: loop body
LE: loop exit
PB: predicated region body
PF: predicated region fallthrough
CT: control target
= control target key end

     0   :  { %10 = vsyncpa [#allocation4], 0  ;;  %s1070_s0 = inlined_call_operand.hbm [shape: f32[16,32], index: 0, kind: input, shape index: {}]   ;;  %s1071_s1 = inlined_call_operand.vmem [shape: f32[1,32], index: 1, kind: input, shape index: {}]   ;;  %s1072_s2 = inlined_call_operand.vmem [shape: f32[1,32], index: 2, kind: input, shape index: {}]   ;;  %s1073_s3 = inlined_call_operand.hbm [shape: f32[32,32], index: 3, kind: input, shape index: {}]   ;;  %s1074_s4 = inlined_call_operand.vmem [shape: f32[1,32], index: 4, kind: input, shape index: {}]   ;;  %s1075_s5 = inlined_call_operand.hbm [shape: f32[16,32], index: 5, kind: output, shape index: {}]  }
   0x1   :  { %12 = vsyncpa [#allocation4 + $0x1], 0 }
   0x2   :  { %13 = vsyncpa [#allocation7], 0 }
   0x3   :  { %14 = vsyncpa [#allocation5], 0 }
   0x4   :  { %16 = vsyncpa [#allocation5 + $0x1], 0  ;;  %s838_s18 = smov 0   ;;  %s840_s19 = smov 0  }
   0x5   :  { %s842_s20 = smov 0   ;;  %s844_s21 = smov 0  }
   0x6   :  { %s846_s22 = smov 0   ;;  %s848_s23 = smov 0  }
   0x7 LB: > { %s532_s24 = sadd.s32 4294967295, %s798_s23   ;;  %s533_s25 = sadd.s32 4294967294, %s798_s23   ;;  %s798_s23 = sphi %s848_s23, %s22_s23   ;;  %s794_s22 = sphi %s846_s22, %s1099_s22   ;;  %s790_s21 = sphi %s844_s21, %s1098_s21   ;;  %s786_s20 = sphi %s842_s20, %s1097_s20   ;;  %s782_s19 = sphi %s840_s19, %s1096_s19   ;;  %s778_s18 = sphi %s838_s18, %s1095_s18  }
   0x8   : > { %p54_p0 = scmp.ne.s32.totalorder %s782_s19, %s778_s18  ;;  %p872_p1 = scmp.eq.s32.totalorder %s532_s24, 0 }
   0x9   : > { %p876_p2 = scmp.eq.s32.totalorder %s532_s24, 1  ;;  %p180_p3 = scmp.eq.s32.totalorder %s533_s25, 1 }
   0xa   : > { %s1080_s26 = scalar_select %p872_p1, 1, 0 }
   0xb   : > { %s1081_s27 = scalar_select %p876_p2, 1, 0 }
   0xc   : > { %p882_p4 = por %p872_p1, %p54_p0  ;;  %p534_p5 = scmp.ge.s32.totalorder %s798_s23, 1 }
   0xd   : > { %p887_p6 = por %p180_p3, %p54_p0  ;;  %p187_p7 = scmp.lt.s32.totalorder %s798_s23, 3 }
   0xe   : > { %s1082_s28 = scalar_select %p882_p4, 1, 0 }
   0xf   : > { %s1083_s29 = scalar_select %p887_p6, 1, 0 }
  0x10   : > { %p892_p8 = pnand %p534_p5, %p187_p7  ;;  %s800_s6 = smov [#allocation6]  }
  0x11   : > { %s207_s7 = sshll.u32 %s800_s6, 4  ;;  %s34_s9 = sadd.s32 1, %s794_s22  ;;  %s208_s7 = int_to_ptr.vmem [resolvable:$true] %s207_s7 }
  0x12   : > { %s1084_s30 = scalar_select %p892_p8, 1, 0 }
  0x13   : > { %p582_p9 = pneg %p892_p8  ;;  %s654_s12 = scalar_lea.hbm %s1073_s3, 512 }
  0x14   : > { %p655_p12 = scmp.ne.s32.totalorder %s1073_s3, %s654_s12  ;;  %p661_p5 = scmp.lt.u32.totalorder %s654_s12, %s1073_s3 }
  0x15   : > { %p901_p11 = pnand %p582_p9, %p872_p1 }
  0x17   : > { %p656_p13 = pneg %p901_p11 }
  0x19   : > { %p657_p0 = pnand %p656_p13, %p655_p12 }
  0x1b   : > { %p658_p3 = pneg %p657_p0 }
  0x1d   : > { %p663_p7 = pnand %p661_p5, %p658_p3 }
  0x1f   : > { %666 = shalt.err (!%p663_p7)
}
  0x20   : > { %s667_s17 = scalar_lea.vmem %s208_s7, 512  ;;  %p675_p1 = scmp.lt.s32.totalorder %s208_s7, %s208_s7 }
  0x21   : > { %p668_p9 = scmp.ne.s32.totalorder %s208_s7, %s667_s17  ;;  %p676_p4 = scmp.lt.s32.totalorder %s667_s17, %s667_s17 }
  0x23   : > { %p670_p10 = pnand %p668_p9, %p656_p13  ;;  %p677_p8 = por %p676_p4, %p675_p1 }
  0x25   : > { %p671_p6 = pneg %p670_p10 }
  0x27   : > { %p678_p2 = pnand %p677_p8, %p671_p6 }
  0x29   : > { %681 = shalt.err (!%p678_p2)
}
  0x2a   : > { %s801_s24 = smov 128   ;;  %s802_s25 = smov 8  }
  0x2b   : > { %585 = dma.hbm_to_vmem [thread:$0]  (!%p901_p11), %s1073_s3, 512, %s208_s7, [#allocation7], %s801_s24, %s801_s24, %s802_s25  }
  0x2c   : > { %p36_p1 = scmp.ge.s32.totalorder %s34_s9, 2  ;;  %s41_s11 = sadd.s32 1, %s786_s20 }
  0x2d   : > { %p48_p2 = scmp.ne.s32.totalorder %s786_s20, %s782_s19  ;;  %p49_p4 = scmp.eq.s32.totalorder %s798_s23, 0 }
  0x2e   : > { %s1101_s9 = smov (%p36_p1, %s34_s9), 0  ;;  %p1087_p8 = scmp.ne.s32.totalorder %s1081_s27, 0 }
  0x2f   : > { %p928_p6 = por %p49_p4, %p48_p2  ;;  %s38_s8 = ssub.s32 %s794_s22, %s1101_s9 }
  0x30   : > { %p934_p10 = por %p1087_p8, %p48_p2  ;;  %p595_p12 = scmp.lt.s32.totalorder %s798_s23, 2 }
  0x31   : > { %p39_p11 = scmp.eq.s32.totalorder %s38_s8, 0  ;;  %s227_s7 = sand.u32 1, %s786_s20  }
  0x32   : > { %s538_s14 = sshll.u32 %s227_s7, 3  ;;  %s539_s16 = sshll.u32 %s794_s22, 7 }
  0x33   : > { %s943_s15 = scalar_select %p39_p11, %s786_s20, %s41_s11  }
  0x34   : > { %s949_s25 = scalar_lea.hbm %s1070_s0, %s539_s16  ;;  %s231_s27 = scalar_lea.vmem [#allocation3], %s538_s14 }
  0x35   : > { %s238_s6 = sshll.u32 %s231_s27, 4  ;;  %p955_p13 = pnand %p595_p12, %p928_p6  ;;  %s951_s6 = int_to_ptr.vmem [resolvable:$true] %s238_s6 }
  0x36   : > { %s228_s11 = scalar_lea.sflag [#allocation4], %s227_s7  ;;  %s682_s8 = scalar_lea.hbm %s949_s25, 128 }
  0x37   : > { %p683_p0 = scmp.ne.s32.totalorder %s949_s25, %s682_s8  ;;  %p684_p3 = pneg %p955_p13 }
  0x38   : > { %s687_s17 = scalar_lea.hbm %s1070_s0, 256  ;;  %p688_p9 = scmp.lt.u32.totalorder %s949_s25, %s1070_s0 }
  0x39   : > { %p685_p5 = pnand %p684_p3, %p683_p0  ;;  %p689_p1 = scmp.lt.u32.totalorder %s687_s17, %s682_s8 }
  0x3a   : > { %p691_p4 = scmp.lt.u32.totalorder %s682_s8, %s949_s25 }
  0x3b   : > { %p686_p7 = pneg %p685_p5  ;;  %p690_p2 = por %p689_p1, %p688_p9 }
  0x3d   : > { %p692_p6 = por %p691_p4, %p690_p2 }
  0x3f   : > { %p693_p8 = pnand %p692_p6, %p686_p7 }
  0x41   : > { %696 = shalt.err (!%p693_p8)
}
  0x42   : > { %s697_s7 = scalar_lea.vmem %s951_s6, 128  ;;  %s803_s27 = smov [#allocation3]  }
  0x43   : > { %p698_p12 = scmp.ne.s32.totalorder %s951_s6, %s697_s7  ;;  %s702_s14 = sshll.u32 %s803_s27, 4  ;;  %s703_s14 = int_to_ptr.vmem [resolvable:$false] %s702_s14 }
  0x44   : > { %s704_s16 = scalar_lea.vmem %s703_s14, 256  ;;  %p705_p5 = scmp.lt.s32.totalorder %s951_s6, %s703_s14 }
  0x45   : > { %p700_p11 = pnand %p698_p12, %p684_p3  ;;  %p706_p9 = scmp.lt.s32.totalorder %s704_s16, %s697_s7 }
  0x47   : > { %p701_p0 = pneg %p700_p11  ;;  %p707_p1 = por %p706_p9, %p705_p5 }
  0x49   : > { %p708_p2 = pnand %p707_p1, %p701_p0 }
  0x4b   : > { %711 = shalt.err (!%p708_p2)
}
  0x4c   : > { %589 = dma.hbm_to_vmem [thread:$0]  (!%p955_p13), %s949_s25, 128, %s951_s6, %s228_s11  }
  0x4d   : > { %p1090_p7 = scmp.ne.s32.totalorder %s1084_s30, 0 }
  0x4e   : > { %s987_s8 = sand.u32 (!%p1090_p7), 1, %s782_s19   ;;  %p1091_p3 = scmp.ne.s32.totalorder (!%p1090_p7), %s1082_s28, 0 }
  0x4f   : > { %247 = sbr.rel (%p1090_p7) target bundleno = 640 (0x280), region = 40  ;;  %s541_s17 = sshll.u32 (!%p1090_p7), %s987_s8, 3 }
  0x50   : > { %s250_s12 = scalar_lea.sflag (!%p1090_p7), [#allocation4], %s987_s8  ;;  %s253_s24 = scalar_lea.vmem (!%p1090_p7), [#allocation3], %s541_s17 }
  0x56   : > { %765 = dma.done.wait (%p1091_p3), %s250_s12, 128  }
  0x57   : > { %767 = vsyncadd (%p1091_p3), %s250_s12, 4294967168  ;;  %p1092_p13 = scmp.ne.s32.totalorder %s1080_s26, 0 }
  0x59   : > { %769 = dma.done.wait (%p1092_p13), [#allocation7], 512  }
  0x5a   : > { %771 = vsyncadd (%p1092_p13), [#allocation7], 4294966784  ;;  %vm297_vm0 = vcmask 261120   ;;  %v294_v0 = vld [vmem:[%s253_s24] sm:$0xff]  ;;  %v328_v7 = vld [vmem:[#allocation6] sm:$0xff]  ;;  %v804_v10 = vmov 0.0|0.0  }
  0x5b   : > { %v298_v1 = vsel %vm297_vm0, %v294_v0, 0.0  ;;  %v329_v8 = vld [vmem:[#allocation6 + $0x8] sm:$0xff]  ;;  %568 = vmatprep.subr.bf16.mxu0 %v804_v10  ;;  %v330_v11 = vld [vmem:[#allocation6 + $0x10] sm:$0xff]  ;;  %v331_v12 = vld [vmem:[#allocation6 + $0x18] sm:$0xff]  ;;  %vm805_vm1 = vmmov 0   ;;  %v806_v14 = vmov 0.0  }
  0x5c   : > { %299 = vadd.xlane.f32.xlu0 %v298_v1  ;;  %v569_v9 = vpack.c.bf16 %v329_v8, %v328_v7  ;;  %v572_v13 = vpack.c.bf16 %v331_v12, %v330_v11  ;;  %565 = vmatprep.mubr.msk.f32.mxu0 %vm805_vm1, %v806_v14  ;;  %v544_v19 = vld [vmem:[%s1071_s1] ss:$0 sm:$0xff]  ;;  %s549_s11 = sshll.u32 %s790_s21, 7  ;;  %s286_s7 = scalar_lea.vmem [#allocation8], %s541_s17 }
  0x5d   : > { %v545_v21 = vld [vmem:[%s1072_s2] ss:$0 sm:$0xff]  ;;  %s429_s27 = sshll.u32 %s286_s7, 4  ;;  %s1020_s12 = scalar_lea.hbm %s1075_s5, %s549_s11  ;;  %s1022_s27 = int_to_ptr.vmem [resolvable:$true] %s429_s27 }
  0x5e   : > { %570 = vmatpush3.bf16.msra.mxu0 %v569_v9  ;;  %v546_v25 = vld [vmem:[%s1074_s4] ss:$0 sm:$0xff]  ;;  %s415_s24 = scalar_lea.sflag [#allocation5], %s987_s8  ;;  %s712_s21 = scalar_lea.vmem %s1022_s27, 128 }
  0x5f   : > { %571 = vmatprep.subr.bf16.mxu0 %v804_v10  ;;  %p713_p4 = scmp.ne.s32.totalorder %s1022_s27, %s712_s21  ;;  %s807_s17 = smov [#allocation8]  }
  0x60   : > { %s716_s26 = sshll.u32 %s807_s17, 4  ;;  %s717_s26 = int_to_ptr.vmem [resolvable:$false] %s716_s26 }
  0x61   : > { %p714_p6 = pnand %p713_p4, %p934_p10  ;;  %s718_s28 = scalar_lea.vmem %s717_s26, 256 }
  0x62   : > { %573 = vmatpush3.bf16.msra.mxu0 %v572_v13  ;;  %p719_p12 = scmp.lt.s32.totalorder %s1022_s27, %s717_s26  ;;  %p720_p11 = scmp.lt.s32.totalorder %s718_s28, %s712_s21 }
  0x63   : > { %p715_p8 = pneg %p714_p6 }
  0x64   : > { %p721_p0 = por %p720_p11, %p719_p12 }
  0x66   : > { %p722_p5 = pnand %p721_p0, %p715_p8 }
  0xe9   : > { %v300_v2 = vpop.xlane.xlu0 %299 }
  0xea   : > { %v302_v3 = vmul.f32 0.03125, %v300_v2 }
  0xec   : > { %v303_v4 = vsub.f32 %v294_v0, %v302_v3 }
  0xee   : > { %v304_v5 = vmul.f32 %v303_v4, %v303_v4 }
  0xf0   : > { %v305_v6 = vsel %vm297_vm0, %v304_v5, 0.0 }
  0xf1   : > { %306 = vadd.xlane.f32.xlu0 %v305_v6 }
 0x17e   : > { %v307_v15 = vpop.xlane.xlu0 %306 }
 0x17f   : > { %v308_v16 = vmul.f32 0.03125, %v307_v15 }
 0x181   : > { %v309_v17 = vadd.f32 1e-05, %v308_v16 }
 0x183   : > { %652 = vrsqrt.f32 %v309_v17 }
 0x18d   : > { %v653_v18 = vpop.eup %652 }
 0x18e   : > { %v311_v20 = vmul.f32 %v653_v18, %v303_v4 }
 0x190   : > { %v318_v22 = vmul.f32 %v544_v19, %v311_v20 }
 0x192   : > { %v325_v23 = vadd.f32 %v545_v21, %v318_v22 }
 0x194   : > { %326 = vst.msk [vmem:[#allocation2] sm:$0xff] %vm297_vm0, %v325_v23 }
 0x19b   : > { %v327_v24 = vld [vmem:[#allocation2] sm:$0xff] }
 0x19c   : > { %566 = vmatmul.mubr.msk.f32.vlgmr.msra.gmra.mrb[0].mxu0 %vm297_vm0, %v327_v24 }
 0x26f   : > { %v409_v26 = vpop.f32.mrb[0].mxu0 }
 0x270   : > { %v410_v27 = vadd.f32 %v546_v25, %v409_v26  ;;  %v567_v28 = vpop.f32.mrb[1].mxu0 }
 0x272   : > { %413 = vst.msk [vmem:[%s286_s7] sm:$0xff] %vm297_vm0, %v410_v27 }
 0x273   : > { %725 = shalt.err (!%p722_p5)
}
 0x274   : > { %s726_s8 = scalar_lea.hbm %s1020_s12, 128  ;;  %s730_s6 = scalar_lea.hbm %s1075_s5, 256 }
 0x275   : > { %p727_p9 = scmp.ne.s32.totalorder %s1020_s12, %s726_s8  ;;  %p731_p7 = scmp.lt.u32.totalorder %s1020_s12, %s1075_s5 }
 0x276   : > { %p732_p3 = scmp.lt.u32.totalorder %s730_s6, %s726_s8  ;;  %p734_p4 = scmp.lt.u32.totalorder %s726_s8, %s1020_s12 }
 0x277   : > { %p728_p1 = pnand %p727_p9, %p934_p10 }
 0x278   : > { %p733_p13 = por %p732_p3, %p731_p7 }
 0x279   : > { %p729_p2 = pneg %p728_p1 }
 0x27a   : > { %p735_p6 = por %p734_p4, %p733_p13 }
 0x27c   : > { %p736_p8 = pnand %p735_p6, %p729_p2 }
 0x27e   : > { %739 = shalt.err (!%p736_p8)
}
 0x27f   : > { %580 = dma.vmem_to_hbm [thread:$0]  (%p934_p10), %s1022_s27, 128, %s1020_s12, %s415_s24  }
 0x280 PF: > { %s441_s7 = sand.u32 1, %s778_s18   ;;  %p1093_p12 = scmp.ne.s32.totalorder %s1083_s29, 0 }
 0x281   : > { %p1094_p11 = scmp.ge.s32.totalorder %s798_s23, 2  ;;  %s442_s14 = scalar_lea.sflag [#allocation5], %s441_s7 }
 0x283   : > { %p591_p0 = pnand %p1094_p11, %p1093_p12 }
 0x285   : > { %773 = dma.done.wait (!%p591_p0), %s442_s14, 128  }
 0x286   : > { %775 = vsyncadd (!%p591_p0), %s442_s14, 4294967168  ;;  %s22_s23 = sadd.s32 1, %s798_s23   ;;  %s1095_s18 = smov %s782_s19 }
 0x287   : > { %p19_p5 = scmp.ge.s32.totalorder %s22_s23, 4   ;;  %s1096_s19 = smov %s786_s20 }
 0x288   : > { %s1097_s20 = smov %s943_s15  ;;  %s1098_s21 = smov %s794_s22 }
 0x289   : > { %s1099_s22 = smov %s1101_s9  ;;  %21 = sbr.rel (!%p19_p5) target bundleno = 7 (0x7), region = 97 }
 0x290   :  { %447 = vsyncpa [#allocation4], 1 }
 0x291   :  { %449 = vsyncpa [#allocation4 + $0x1], 1 }
 0x292   :  { %450 = vsyncpa [#allocation7], 1 }
 0x293   :  { %451 = vsyncpa [#allocation5], 1 }
 0x294   :  { %453 = vsyncpa [#allocation5 + $0x1], 1 }

</bundles_post_ra>
